<compile_context>
chip_gen: v7x
topology: tpu7x:2x2x1
jax: 0.10.0
libtpu: 0.0.40
codegen_flags: <defaults>
</compile_context>

<pallas_src>
import functools

import jax
import jax.numpy as jnp
from jax.experimental import pallas as pl
from jax.experimental.pallas import tpu as pltpu


def _round_up(x, m):
    return ((x + m - 1) // m) * m


# ---------------------------------------------------------------------------
# Fused kernel: the entire MLP in one body.
#   refs = (x_ref, w0_ref, ..., w{L-1}_ref, b_stack_ref, o_ref)
# ---------------------------------------------------------------------------
def _fused_mlp_kernel(*refs, num_layers, out_dims_pad):
    x_ref = refs[0]
    w_refs = refs[1:1 + num_layers]
    b_ref = refs[1 + num_layers]          # (8, max_out_pad), row l = bias of layer l
    o_ref = refs[2 + num_layers]

    h = x_ref[...]                        # (TM, in_pad) f32
    for l in range(num_layers):
        out_pad = out_dims_pad[l]
        # MXU matmul with f32 accumulation, then fused bias (+ ReLU) on the VPU.
        y = jnp.dot(h, w_refs[l][...], preferred_element_type=jnp.float32)
        y = y + b_ref[l:l + 1, :out_pad]  # (TM, out_pad) + (1, out_pad)
        if l < num_layers - 1:            # hidden layers: ReLU (dropout = identity in eval)
            y = jnp.maximum(y, 0.0)
        h = y
    o_ref[...] = h.astype(o_ref.dtype)


# ---------------------------------------------------------------------------
# Wrapper: pad to lane/sublane-dense shapes, build specs, call once.
# ---------------------------------------------------------------------------
def net_forward_fused(x, folded_params, *, num_classes):
    """x: (B, input_size) f32. folded_params: list of {'w': (in,out), 'b': (out,)}."""
    B, in_dim = x.shape
    L = len(folded_params)

    dims = [in_dim] + [p["w"].shape[1] for p in folded_params]
    dims_pad = [_round_up(d, 128) for d in dims]          # lane-dense feature dims

    # Batch tiling: small batches -> one sublane-aligned block; large -> 128-row tiles.
    if B <= 128:
        TM = _round_up(B, 8)
        B_pad = TM
    else:
        TM = 128
        B_pad = _round_up(B, 128)
    grid_m = B_pad // TM

    # Zero-pad activations / weights / biases (zeros keep the math exact).
    x_p = jnp.zeros((B_pad, dims_pad[0]), jnp.float32).at[:B, :in_dim].set(x)

    w_p = []
    for l, p in enumerate(folded_params):
        wp = jnp.zeros((dims_pad[l], dims_pad[l + 1]), jnp.float32)
        wp = wp.at[:dims[l], :dims[l + 1]].set(p["w"])
        w_p.append(wp)

    max_out_pad = max(dims_pad[1:])
    b_rows = max(8, L)                                    # keep sublane-aligned
    b_stack = jnp.zeros((b_rows, max_out_pad), jnp.float32)
    for l, p in enumerate(folded_params):
        b_stack = b_stack.at[l, :dims[l + 1]].set(p["b"])

    kernel = functools.partial(_fused_mlp_kernel,
                               num_layers=L,
                               out_dims_pad=tuple(dims_pad[1:]))

    in_specs = [pl.BlockSpec((TM, dims_pad[0]), lambda i: (i, 0))]
    for l in range(L):
        # Same block for every grid step -> weights stay resident in VMEM.
        in_specs.append(
            pl.BlockSpec((dims_pad[l], dims_pad[l + 1]), lambda i: (0, 0)))
    in_specs.append(pl.BlockSpec((b_rows, max_out_pad), lambda i: (0, 0)))

    out_specs = pl.BlockSpec((TM, dims_pad[-1]), lambda i: (i, 0))

    flops = sum(2 * B_pad * dims_pad[l] * dims_pad[l + 1] for l in range(L))
    bytes_accessed = 4 * (x_p.size + sum(w.size for w in w_p)
                          + b_stack.size + B_pad * dims_pad[-1])

    out_p = pl.pallas_call(
        kernel,
        out_shape=jax.ShapeDtypeStruct((B_pad, dims_pad[-1]), jnp.float32),
        grid_spec=pltpu.PrefetchScalarGridSpec(
            num_scalar_prefetch=0,
            grid=(grid_m,),
            in_specs=in_specs,
            out_specs=out_specs,
        ),
        compiler_params=pltpu.CompilerParams(
            dimension_semantics=("parallel",),      # megacore sharding over M on v7x
            vmem_limit_bytes=64 * 1024 * 1024,
        ),
        cost_estimate=pl.CostEstimate(
            flops=flops, transcendentals=0, bytes_accessed=bytes_accessed),
    )(x_p, *w_p, b_stack)

    return out_p[:B, :num_classes]


# ---------------------------------------------------------------------------
# Parameter construction (matches PyTorch module shapes) + BN folding.
# ---------------------------------------------------------------------------
def init_raw_params(key, input_size, num_classes, hidden_dims, batchnorm):
    params = []
    in_dim = input_size
    dims = list(hidden_dims) + [num_classes]
    for li, out_dim in enumerate(dims):
        key, kw, kb, kg, kbeta, km, kv = jax.random.split(key, 7)
        bound = 1.0 / jnp.sqrt(in_dim)
        # Stored as (in, out) == PyTorch weight.T, so forward is x @ w.
        w = jax.random.uniform(kw, (in_dim, out_dim), jnp.float32, -bound, bound)
        b = jax.random.uniform(kb, (out_dim,), jnp.float32, -bound, bound)
        is_hidden = li < len(hidden_dims)
        bn = None
        if batchnorm and is_hidden:
            gamma = 1.0 + 0.1 * jax.random.normal(kg, (out_dim,), jnp.float32)
            beta = 0.1 * jax.random.normal(kbeta, (out_dim,), jnp.float32)
            running_mean = 0.1 * jax.random.normal(km, (out_dim,), jnp.float32)
            running_var = jnp.abs(
                1.0 + 0.1 * jax.random.normal(kv, (out_dim,), jnp.float32))
            bn = (gamma, beta, running_mean, running_var, 1e-5)
        params.append(dict(w=w, b=b, bn=bn, relu=is_hidden))
        in_dim = out_dim
    return params


def fold_params(raw_params):
    """Fold eval-mode BatchNorm into weight/bias: W' = W*scale, b' = b*scale+shift."""
    folded = []
    for p in raw_params:
        w, b = p["w"], p["b"]
        if p["bn"] is not None:
            gamma, beta, mean, var, eps = p["bn"]
            scale = gamma / jnp.sqrt(var + eps)          # keep fold in f32
            shift = beta - mean * scale
            w = w * scale[None, :]
            b = b * scale + shift
        folded.append(dict(w=w, b=b))
    return folded


def reference_forward(raw_params, x):
    """Plain-JAX eval-mode reference (dropout = identity)."""
    h = x
    for p in raw_params:
        h = h @ p["w"] + p["b"]
        if p["bn"] is not None:
            gamma, beta, mean, var, eps = p["bn"]
            h = (h - mean) / jnp.sqrt(var + eps) * gamma + beta
        if p["relu"]:
            h = jnp.maximum(h, 0.0)
    return h


if __name__ == "__main__":
    # Small shapes consistent with the module's forward: x is (batch, input_size).
    batch = 8
    input_size = 32
    hidden_dims = [64, 48]
    num_classes = 16
    dropout = 0.5        # eval mode -> identity
    batchnorm = True

    key = jax.random.PRNGKey(0)
    key, kx = jax.random.split(key)
    x = jax.random.normal(kx, (batch, input_size), jnp.float32)

    raw_params = init_raw_params(key, input_size, num_classes, hidden_dims,
                                 batchnorm)
    folded = fold_params(raw_params)

    fwd = jax.jit(functools.partial(net_forward_fused,
                                    folded_params=folded,
                                    num_classes=num_classes))
    out = jax.block_until_ready(fwd(x))

    # Reference check against un-folded eval-mode math.
    ref = reference_forward(raw_params, x)
    assert out.shape == (batch, num_classes)
    assert jnp.allclose(out, ref, atol=1e-4, rtol=1e-4), (
        float(jnp.max(jnp.abs(out - ref))))

    print("KERNEL_OK")
</pallas_src>

<mosaic_0001>
module attributes {stable_mosaic.version = 11 : i64} {
  func.func @_fused_mlp_kernel(%arg0: i32, %arg1: memref<8x128xf32, #tpu.memory_space<vmem>>, %arg2: memref<128x128xf32, #tpu.memory_space<vmem>>, %arg3: memref<128x128xf32, #tpu.memory_space<vmem>>, %arg4: memref<128x128xf32, #tpu.memory_space<vmem>>, %arg5: memref<8x128xf32, #tpu.memory_space<vmem>>, %arg6: memref<8x128xf32, #tpu.memory_space<vmem>>) attributes {dimension_semantics = [#tpu.dimension_semantics<parallel>], iteration_bounds = array<i64: 1>, scalar_prefetch = 0 : i64, scratch_operands = 0 : i64, tpu.core_type = #tpu.core_type<tc>, window_params = [{transform_indices = @transform_0, window_bounds = array<i64: 8, 128>}, {pipeline_mode = #tpu.pipeline_mode<synchronous>, transform_indices = @transform_1, window_bounds = array<i64: 128, 128>}, {pipeline_mode = #tpu.pipeline_mode<synchronous>, transform_indices = @transform_2, window_bounds = array<i64: 128, 128>}, {pipeline_mode = #tpu.pipeline_mode<synchronous>, transform_indices = @transform_3, window_bounds = array<i64: 128, 128>}, {pipeline_mode = #tpu.pipeline_mode<synchronous>, transform_indices = @transform_4, window_bounds = array<i64: 8, 128>}, {transform_indices = @transform_5, window_bounds = array<i64: 8, 128>}]} {
    %c0 = arith.constant 0 : index
    %c0_0 = arith.constant 0 : index
    %0 = vector.load %arg1[%c0, %c0_0] : memref<8x128xf32, #tpu.memory_space<vmem>>, vector<8x128xf32>
    %c0_1 = arith.constant 0 : index
    %c0_2 = arith.constant 0 : index
    %1 = vector.load %arg2[%c0_1, %c0_2] : memref<128x128xf32, #tpu.memory_space<vmem>>, vector<128x128xf32>
    %cst = arith.constant dense<0.000000e+00> : vector<8x128xf32>
    %2 = tpu.matmul %0, %1, %cst {dimension_numbers = #tpu.dot_dimension_numbers<[1], [0], [0], [1], [0, 0, 1, 1], [], []>} : vector<8x128xf32>, vector<128x128xf32>, vector<8x128xf32> -> vector<8x128xf32>
    %c0_3 = arith.constant 0 : index
    %c0_4 = arith.constant 0 : index
    %3 = vector.load %arg5[%c0_3, %c0_4] : memref<8x128xf32, #tpu.memory_space<vmem>>, vector<1x128xf32>
    %4 = vector.broadcast %3 : vector<1x128xf32> to vector<8x128xf32>
    %5 = arith.addf %2, %4 : vector<8x128xf32>
    %cst_5 = arith.constant 0.000000e+00 : f32
    %6 = vector.broadcast %cst_5 : f32 to vector<8x128xf32>
    %7 = arith.maximumf %5, %6 : vector<8x128xf32>
    %c0_6 = arith.constant 0 : index
    %c0_7 = arith.constant 0 : index
    %8 = vector.load %arg3[%c0_6, %c0_7] : memref<128x128xf32, #tpu.memory_space<vmem>>, vector<128x128xf32>
    %cst_8 = arith.constant dense<0.000000e+00> : vector<8x128xf32>
    %9 = tpu.matmul %7, %8, %cst_8 {dimension_numbers = #tpu.dot_dimension_numbers<[1], [0], [0], [1], [0, 0, 1, 1], [], []>} : vector<8x128xf32>, vector<128x128xf32>, vector<8x128xf32> -> vector<8x128xf32>
    %c1 = arith.constant 1 : index
    %c0_9 = arith.constant 0 : index
    %10 = vector.load %arg5[%c1, %c0_9] : memref<8x128xf32, #tpu.memory_space<vmem>>, vector<1x128xf32>
    %11 = vector.broadcast %10 : vector<1x128xf32> to vector<8x128xf32>
    %12 = arith.addf %9, %11 : vector<8x128xf32>
    %cst_10 = arith.constant 0.000000e+00 : f32
    %13 = vector.broadcast %cst_10 : f32 to vector<8x128xf32>
    %14 = arith.maximumf %12, %13 : vector<8x128xf32>
    %c0_11 = arith.constant 0 : index
    %c0_12 = arith.constant 0 : index
    %15 = vector.load %arg4[%c0_11, %c0_12] : memref<128x128xf32, #tpu.memory_space<vmem>>, vector<128x128xf32>
    %cst_13 = arith.constant dense<0.000000e+00> : vector<8x128xf32>
    %16 = tpu.matmul %14, %15, %cst_13 {dimension_numbers = #tpu.dot_dimension_numbers<[1], [0], [0], [1], [0, 0, 1, 1], [], []>} : vector<8x128xf32>, vector<128x128xf32>, vector<8x128xf32> -> vector<8x128xf32>
    %c2 = arith.constant 2 : index
    %c0_14 = arith.constant 0 : index
    %17 = vector.load %arg5[%c2, %c0_14] : memref<8x128xf32, #tpu.memory_space<vmem>>, vector<1x128xf32>
    %18 = vector.broadcast %17 : vector<1x128xf32> to vector<8x128xf32>
    %19 = arith.addf %16, %18 : vector<8x128xf32>
    %c0_15 = arith.constant 0 : index
    %c0_16 = arith.constant 0 : index
    %20 = vector.load %arg6[%c0_15, %c0_16] : memref<8x128xf32, #tpu.memory_space<vmem>>, vector<8x128xf32>
    tpu.vector_store %arg6[%c0_15, %c0_16], %19 {strides = array<i32>} : memref<8x128xf32, #tpu.memory_space<vmem>>, vector<8x128xf32>,
    return
  }
  func.func @transform_0(%arg0: i32) -> (i32, i32) {
    %c0_i32 = arith.constant 0 : i32
    %c0_i32_0 = arith.constant 0 : i32
    return %arg0, %c0_i32 : i32, i32
  }
  func.func @transform_1(%arg0: i32) -> (i32, i32) {
    %c0_i32 = arith.constant 0 : i32
    %c0_i32_0 = arith.constant 0 : i32
    %c0_i32_1 = arith.constant 0 : i32
    return %c0_i32, %c0_i32_0 : i32, i32
  }
  func.func @transform_2(%arg0: i32) -> (i32, i32) {
    %c0_i32 = arith.constant 0 : i32
    %c0_i32_0 = arith.constant 0 : i32
    %c0_i32_1 = arith.constant 0 : i32
    return %c0_i32, %c0_i32_0 : i32, i32
  }
  func.func @transform_3(%arg0: i32) -> (i32, i32) {
    %c0_i32 = arith.constant 0 : i32
    %c0_i32_0 = arith.constant 0 : i32
    %c0_i32_1 = arith.constant 0 : i32
    return %c0_i32, %c0_i32_0 : i32, i32
  }
  func.func @transform_4(%arg0: i32) -> (i32, i32) {
    %c0_i32 = arith.constant 0 : i32
    %c0_i32_0 = arith.constant 0 : i32
    %c0_i32_1 = arith.constant 0 : i32
    return %c0_i32, %c0_i32_0 : i32, i32
  }
  func.func @transform_5(%arg0: i32) -> (i32, i32) {
    %c0_i32 = arith.constant 0 : i32
    %c0_i32_0 = arith.constant 0 : i32
    return %arg0, %c0_i32 : i32, i32
  }
}

</mosaic_0001>

<bundles_post_ra>
// kernel: net_forward_fused.1
= control target key start
LH: loop header
LB: loop body
LE: loop exit
PB: predicated region body
PF: predicated region fallthrough
CT: control target
= control target key end

     0   :  { %10 = vsyncpa [#allocation3], 0  ;;  %s913_s0 = inlined_call_operand.hbm [shape: f32[8,128], index: 0, kind: input, shape index: {}]   ;;  %s914_s1 = inlined_call_operand.hbm [shape: f32[128,128], index: 1, kind: input, shape index: {}]   ;;  %s915_s2 = inlined_call_operand.hbm [shape: f32[128,128], index: 2, kind: input, shape index: {}]   ;;  %s916_s3 = inlined_call_operand.hbm [shape: f32[128,128], index: 3, kind: input, shape index: {}]   ;;  %s917_s4 = inlined_call_operand.hbm [shape: f32[8,128], index: 4, kind: input, shape index: {}]   ;;  %s918_s5 = inlined_call_operand.hbm [shape: f32[8,128], index: 5, kind: output, shape index: {}]  }
   0x1   :  { %11 = vsyncpa [#allocation6], 0 }
   0x2   :  { %12 = vsyncpa [#allocation9], 0 }
   0x3   :  { %13 = vsyncpa [#allocation4], 0  ;;  %s761_s18 = smov [#allocation5]   ;;  %s621_s22 = scalar_lea.hbm %s914_s1, 2048 }
   0x4   :  { %s29_s19 = sshll.u32 %s761_s18, 4  ;;  %p622_p0 = scmp.ne.s32.totalorder %s914_s1, %s621_s22  ;;  %s30_s19 = int_to_ptr.vmem [resolvable:$true] %s29_s19 }
   0x5   :  { %p625_p1 = scmp.lt.u32.totalorder %s621_s22, %s914_s1 }
   0x7   :  { %p627_p2 = pnand %p625_p1, %p622_p0 }
   0x9   :  { %630 = shalt.err (!%p627_p2)
}
   0xa   :  { %s631_s27 = scalar_lea.vmem %s30_s19, 2048  ;;  %p636_p4 = scmp.lt.s32.totalorder %s30_s19, %s30_s19 }
   0xb   :  { %p632_p3 = scmp.ne.s32.totalorder %s30_s19, %s631_s27  ;;  %p637_p5 = scmp.lt.s32.totalorder %s631_s27, %s631_s27 }
   0xd   :  { %p638_p6 = por %p637_p5, %p636_p4 }
   0xf   :  { %p639_p7 = pnand %p638_p6, %p632_p3 }
  0x11   :  { %642 = shalt.err (!%p639_p7)
}
  0x12   :  { %s762_s28 = smov 128   ;;  %s763_s29 = smov 8  }
  0x13   :  { %35 = dma.hbm_to_vmem [thread:$0]  %s914_s1, 2048, %s30_s19, [#allocation6], %s762_s28, %s762_s28, %s763_s29  }
  0x14   :  { %s764_s7 = smov [#allocation8]   ;;  %s765_s9 = smov [#allocation2]  }
  0x15   :  { %s53_s8 = sshll.u32 %s764_s7, 4  ;;  %s20_s10 = sshll.u32 %s765_s9, 4  ;;  %s54_s8 = int_to_ptr.vmem [resolvable:$true] %s53_s8  ;;  %s21_s10 = int_to_ptr.vmem [resolvable:$true] %s20_s10 }
  0x16   :  { %s643_s13 = scalar_lea.hbm %s916_s3, 2048 }
  0x17   :  { %p644_p8 = scmp.ne.s32.totalorder %s916_s3, %s643_s13  ;;  %p647_p9 = scmp.lt.u32.totalorder %s643_s13, %s916_s3 }
  0x19   :  { %p649_p10 = pnand %p647_p9, %p644_p8 }
  0x1b   :  { %652 = shalt.err (!%p649_p10)
}
  0x1c   :  { %s653_s1 = scalar_lea.vmem %s54_s8, 2048  ;;  %p658_p12 = scmp.lt.s32.totalorder %s54_s8, %s54_s8 }
  0x1d   :  { %p654_p11 = scmp.ne.s32.totalorder %s54_s8, %s653_s1  ;;  %p659_p13 = scmp.lt.s32.totalorder %s653_s1, %s653_s1 }
  0x1f   :  { %p660_p0 = por %p659_p13, %p658_p12 }
  0x21   :  { %p661_p1 = pnand %p660_p0, %p654_p11 }
  0x23   :  { %664 = shalt.err (!%p661_p1)
}
  0x24   :  { %59 = dma.hbm_to_vmem [thread:$0]  %s916_s3, 2048, %s54_s8, [#allocation9], %s762_s28, %s762_s28, %s763_s29  }
  0x25   :  { %s665_s22 = scalar_lea.hbm %s913_s0, 128 }
  0x26   :  { %p666_p2 = scmp.ne.s32.totalorder %s913_s0, %s665_s22  ;;  %p669_p3 = scmp.lt.u32.totalorder %s665_s22, %s913_s0 }
  0x28   :  { %p671_p4 = pnand %p669_p3, %p666_p2 }
  0x2a   :  { %674 = shalt.err (!%p671_p4)
}
  0x2b   :  { %s675_s27 = scalar_lea.vmem %s21_s10, 128  ;;  %p680_p6 = scmp.lt.s32.totalorder %s21_s10, %s21_s10 }
  0x2c   :  { %p676_p5 = scmp.ne.s32.totalorder %s21_s10, %s675_s27  ;;  %p681_p7 = scmp.lt.s32.totalorder %s675_s27, %s675_s27 }
  0x2e   :  { %p682_p8 = por %p681_p7, %p680_p6 }
  0x30   :  { %p683_p9 = pnand %p682_p8, %p676_p5 }
  0x32   :  { %686 = shalt.err (!%p683_p9)
}
  0x33   :  { %23 = dma.hbm_to_vmem [thread:$0]  %s913_s0, 128, %s21_s10, [#allocation3]  }
  0x34   :  { %s766_s6 = smov [#allocation7]   ;;  %s767_s8 = smov [#allocation10]  }
  0x35   :  { %s41_s7 = sshll.u32 %s766_s6, 4  ;;  %s66_s9 = sshll.u32 %s767_s8, 4  ;;  %s42_s7 = int_to_ptr.vmem [resolvable:$true] %s41_s7  ;;  %s67_s9 = int_to_ptr.vmem [resolvable:$true] %s66_s9 }
  0x36   :  { %s687_s13 = scalar_lea.hbm %s915_s2, 2048 }
  0x37   :  { %p688_p10 = scmp.ne.s32.totalorder %s915_s2, %s687_s13  ;;  %p691_p11 = scmp.lt.u32.totalorder %s687_s13, %s915_s2 }
  0x39   :  { %p693_p12 = pnand %p691_p11, %p688_p10 }
  0x3b   :  { %696 = shalt.err (!%p693_p12)
}
  0x3c   :  { %s697_s0 = scalar_lea.vmem %s42_s7, 2048  ;;  %p702_p0 = scmp.lt.s32.totalorder %s42_s7, %s42_s7 }
  0x3d   :  { %p698_p13 = scmp.ne.s32.totalorder %s42_s7, %s697_s0  ;;  %p703_p1 = scmp.lt.s32.totalorder %s697_s0, %s697_s0 }
  0x3f   :  { %p704_p2 = por %p703_p1, %p702_p0 }
  0x41   :  { %p705_p3 = pnand %p704_p2, %p698_p13 }
  0x43   :  { %708 = shalt.err (!%p705_p3)
}
  0x44   :  { %47 = dma.hbm_to_vmem [thread:$0]  %s915_s2, 2048, %s42_s7, [#allocation6], %s762_s28, %s762_s28, %s763_s29  }
  0x45   :  { %s709_s20 = scalar_lea.hbm %s917_s4, 128 }
  0x46   :  { %p710_p4 = scmp.ne.s32.totalorder %s917_s4, %s709_s20  ;;  %p713_p5 = scmp.lt.u32.totalorder %s709_s20, %s917_s4 }
  0x48   :  { %p715_p6 = pnand %p713_p5, %p710_p4 }
  0x4a   :  { %718 = shalt.err (!%p715_p6)
}
  0x4b   :  { %s719_s25 = scalar_lea.vmem %s67_s9, 128  ;;  %p724_p8 = scmp.lt.s32.totalorder %s67_s9, %s67_s9 }
  0x4c   :  { %p720_p7 = scmp.ne.s32.totalorder %s67_s9, %s719_s25  ;;  %p725_p9 = scmp.lt.s32.totalorder %s719_s25, %s719_s25 }
  0x4e   :  { %p726_p10 = por %p725_p9, %p724_p8 }
  0x50   :  { %p727_p11 = pnand %p726_p10, %p720_p7 }
  0x52   :  { %730 = shalt.err (!%p727_p11)
}
  0x53   :  { %69 = dma.hbm_to_vmem [thread:$0]  %s917_s4, 128, %s67_s9, [#allocation9]  }
  0x54   :  { %753 = dma.done.wait [#allocation3], 128  }
  0x55   :  { %754 = vsyncadd [#allocation3], 4294967168 }
  0x56   :  { %755 = dma.done.wait [#allocation6], 4096  }
  0x57   :  { %756 = vsyncadd [#allocation6], 4294963200 }
  0x58   :  { %757 = dma.done.wait [#allocation9], 2176  }
  0x59   :  { %758 = vsyncadd [#allocation9], 4294965120  ;;  %v768_v0 = vmov 0.0|0.0   ;;  %vm769_vm0 = vmmov 0   ;;  %v770_v1 = vmov 0.0   ;;  %v86_v2 = vld [vmem:[#allocation5] sm:$0xff] }
  0x5a   :  { %538 = vmatprep.subr.bf16.mxu0 %v768_v0  ;;  %465 = vmatprep.mubr.msk.f32.mxu0 %vm769_vm0, %v770_v1  ;;  %v87_v3 = vld [vmem:[#allocation5 + $0x8] sm:$0xff]  ;;  %v88_v4 = vld [vmem:[#allocation5 + $0x10] sm:$0xff]  ;;  %v89_v6 = vld [vmem:[#allocation5 + $0x18] sm:$0xff]  ;;  %s771_s4 = smov [#allocation11]  }
  0x5b   :  { %562 = vmatprep.subr.bf16.mxu1 %v768_v0  ;;  %500 = vmatprep.mubr.msk.f32.mxu1 %vm769_vm0, %v770_v1  ;;  %v539_v5 = vpack.c.bf16 %v87_v3, %v86_v2  ;;  %v542_v7 = vpack.c.bf16 %v89_v6, %v88_v4  ;;  %v90_v8 = vld [vmem:[#allocation5 + $0x20] sm:$0xff]  ;;  %v91_v9 = vld [vmem:[#allocation5 + $0x28] sm:$0xff]  ;;  %v180_v12 = vld [vmem:[#allocation7 + $0x10] sm:$0xff]  ;;  %s368_s29 = sshll.u32 %s771_s4, 4  ;;  %s369_s29 = int_to_ptr.vmem [resolvable:$true] %s368_s29 }
  0x5c   :  { %v178_v10 = vld [vmem:[#allocation7] sm:$0xff]  ;;  %v179_v11 = vld [vmem:[#allocation7 + $0x8] sm:$0xff]  ;;  %v181_v13 = vld [vmem:[#allocation7 + $0x18] sm:$0xff]  ;;  %v545_v14 = vpack.c.bf16 %v91_v9, %v90_v8  ;;  %s731_s26 = scalar_lea.vmem %s369_s29, 128  ;;  %p736_p13 = scmp.lt.s32.totalorder %s369_s29, %s369_s29 }
  0x5d   :  { %540 = vmatpush3.bf16.msra.mxu0 %v539_v5  ;;  %v563_v15 = vpack.c.bf16 %v179_v11, %v178_v10  ;;  %v92_v16 = vld [vmem:[#allocation5 + $0x30] sm:$0xff]  ;;  %v93_v17 = vld [vmem:[#allocation5 + $0x38] sm:$0xff]  ;;  %v566_v18 = vpack.c.bf16 %v181_v13, %v180_v12  ;;  %v182_v19 = vld [vmem:[#allocation7 + $0x20] sm:$0xff]  ;;  %p732_p12 = scmp.ne.s32.totalorder %s369_s29, %s731_s26  ;;  %p737_p0 = scmp.lt.s32.totalorder %s731_s26, %s731_s26 }
  0x5e   :  { %541 = vmatprep.subr.bf16.mxu0 %v768_v0  ;;  %v183_v20 = vld [vmem:[#allocation7 + $0x28] sm:$0xff]  ;;  %v548_v21 = vpack.c.bf16 %v93_v17, %v92_v16  ;;  %v94_v22 = vld [vmem:[#allocation5 + $0x40] sm:$0xff]  ;;  %v184_v25 = vld [vmem:[#allocation7 + $0x30] sm:$0xff] }
  0x5f   :  { %564 = vmatpush3.bf16.msra.mxu1 %v563_v15  ;;  %v95_v23 = vld [vmem:[#allocation5 + $0x48] sm:$0xff]  ;;  %v569_v24 = vpack.c.bf16 %v183_v20, %v182_v19  ;;  %v185_v26 = vld [vmem:[#allocation7 + $0x38] sm:$0xff]  ;;  %v96_v28 = vld [vmem:[#allocation5 + $0x50] sm:$0xff]  ;;  %p738_p1 = por %p737_p0, %p736_p13 }
  0x60   :  { %565 = vmatprep.subr.bf16.mxu1 %v768_v0  ;;  %v551_v27 = vpack.c.bf16 %v95_v23, %v94_v22  ;;  %v97_v29 = vld [vmem:[#allocation5 + $0x58] sm:$0xff]  ;;  %v572_v30 = vpack.c.bf16 %v185_v26, %v184_v25  ;;  %v186_v31 = vld [vmem:[#allocation7 + $0x40] sm:$0xff]  ;;  %v187_v32 = vld [vmem:[#allocation7 + $0x48] sm:$0xff] }
  0x61   :  { %543 = vmatpush3.bf16.msra.mxu0 %v542_v7  ;;  %v554_v33 = vpack.c.bf16 %v97_v29, %v96_v28  ;;  %v98_v34 = vld [vmem:[#allocation5 + $0x60] sm:$0xff]  ;;  %v99_v35 = vld [vmem:[#allocation5 + $0x68] sm:$0xff]  ;;  %v575_v36 = vpack.c.bf16 %v187_v32, %v186_v31  ;;  %v188_v37 = vld [vmem:[#allocation7 + $0x50] sm:$0xff]  ;;  %p739_p2 = pnand %p738_p1, %p732_p12 }
  0x62   :  { %544 = vmatprep.subr.bf16.mxu0 %v768_v0  ;;  %v189_v38 = vld [vmem:[#allocation7 + $0x58] sm:$0xff]  ;;  %v557_v39 = vpack.c.bf16 %v99_v35, %v98_v34  ;;  %v100_v40 = vld [vmem:[#allocation5 + $0x70] sm:$0xff]  ;;  %v190_v43 = vld [vmem:[#allocation7 + $0x60] sm:$0xff] }
  0x63   :  { %567 = vmatpush3.bf16.msra.mxu1 %v566_v18  ;;  %v101_v41 = vld [vmem:[#allocation5 + $0x78] sm:$0xff]  ;;  %v578_v42 = vpack.c.bf16 %v189_v38, %v188_v37  ;;  %v191_v44 = vld [vmem:[#allocation7 + $0x68] sm:$0xff]  ;;  %v192_v48 = vld [vmem:[#allocation7 + $0x70] sm:$0xff] }
  0x64   :  { %568 = vmatprep.subr.bf16.mxu1 %v768_v0  ;;  %v560_v45 = vpack.c.bf16 %v101_v41, %v100_v40  ;;  %v581_v46 = vpack.c.bf16 %v191_v44, %v190_v43  ;;  %v85_v47 = vld [vmem:[#allocation2] sm:$0xff]  ;;  %v270_v51 = vld [vmem:[#allocation8] sm:$0xff]  ;;  %v271_v52 = vld [vmem:[#allocation8 + $0x8] sm:$0xff] }
  0x65   :  { %546 = vmatpush3.bf16.msra.mxu0 %v545_v14  ;;  %v193_v49 = vld [vmem:[#allocation7 + $0x78] sm:$0xff]  ;;  %v272_v53 = vld [vmem:[#allocation8 + $0x10] sm:$0xff]  ;;  %v587_v54 = vpack.c.bf16 %v271_v52, %v270_v51  ;;  %v274_v57 = vld [vmem:[#allocation8 + $0x20] sm:$0xff] }
  0x66   :  { %547 = vmatprep.subr.bf16.mxu0 %v768_v0  ;;  %v584_v50 = vpack.c.bf16 %v193_v49, %v192_v48  ;;  %v273_v55 = vld [vmem:[#allocation8 + $0x18] sm:$0xff]  ;;  %v275_v58 = vld [vmem:[#allocation8 + $0x28] sm:$0xff]  ;;  %v276_v60 = vld [vmem:[#allocation8 + $0x30] sm:$0xff] }
  0x67   :  { %570 = vmatpush3.bf16.msra.mxu1 %v569_v24  ;;  %v590_v56 = vpack.c.bf16 %v273_v55, %v272_v53  ;;  %v593_v59 = vpack.c.bf16 %v275_v58, %v274_v57  ;;  %v277_v61 = vld [vmem:[#allocation8 + $0x38] sm:$0xff]  ;;  %v278_v63 = vld [vmem:[#allocation8 + $0x40] sm:$0xff]  ;;  %v280_v3 = vld [vmem:[#allocation8 + $0x50] sm:$0xff] }
  0x68   :  { %571 = vmatprep.subr.bf16.mxu1 %v768_v0  ;;  %v596_v62 = vpack.c.bf16 %v277_v61, %v276_v60  ;;  %v281_v4 = vld [vmem:[#allocation8 + $0x58] sm:$0xff]  ;;  %v282_v6 = vld [vmem:[#allocation8 + $0x60] sm:$0xff]  ;;  %v283_v7 = vld [vmem:[#allocation8 + $0x68] sm:$0xff] }
  0x69   :  { %549 = vmatpush3.bf16.msra.mxu0 %v548_v21  ;;  %v602_v5 = vpack.c.bf16 %v281_v4, %v280_v3  ;;  %v605_v8 = vpack.c.bf16 %v283_v7, %v282_v6  ;;  %v379_v9 = vld [vmem:[#allocation10] ss:$0 sm:$0xff]  ;;  %v284_v14 = vld [vmem:[#allocation8 + $0x70] sm:$0xff]  ;;  %v285_v15 = vld [vmem:[#allocation8 + $0x78] sm:$0xff] }
  0x6a   :  { %550 = vmatprep.subr.bf16.mxu0 %v768_v0  ;;  %v608_v16 = vpack.c.bf16 %v285_v15, %v284_v14  ;;  %v380_v17 = vld [vmem:[#allocation10 + $0x1] ss:$0 sm:$0xff]  ;;  %v381_v22 = vld [vmem:[#allocation10 + $0x2] ss:$0 sm:$0xff] }
  0x6b   :  { %573 = vmatpush3.bf16.msra.mxu1 %v572_v30 }
  0x6c   :  { %574 = vmatprep.subr.bf16.mxu1 %v768_v0 }
  0x6d   :  { %552 = vmatpush3.bf16.msra.mxu0 %v551_v27 }
  0x6e   :  { %553 = vmatprep.subr.bf16.mxu0 %v768_v0 }
  0x6f   :  { %576 = vmatpush3.bf16.msra.mxu1 %v575_v36 }
  0x70   :  { %577 = vmatprep.subr.bf16.mxu1 %v768_v0 }
  0x71   :  { %555 = vmatpush3.bf16.msra.mxu0 %v554_v33 }
  0x72   :  { %556 = vmatprep.subr.bf16.mxu0 %v768_v0 }
  0x73   :  { %579 = vmatpush3.bf16.msra.mxu1 %v578_v42 }
  0x74   :  { %580 = vmatprep.subr.bf16.mxu1 %v768_v0 }
  0x75   :  { %558 = vmatpush3.bf16.msra.mxu0 %v557_v39 }
  0x76   :  { %559 = vmatprep.subr.bf16.mxu0 %v768_v0 }
  0x77   :  { %582 = vmatpush3.bf16.msra.mxu1 %v581_v46 }
  0x78   :  { %583 = vmatprep.subr.bf16.mxu1 %v768_v0 }
  0x79   :  { %561 = vmatpush3.bf16.msra.mxu0 %v560_v45 }
  0x7a   :  { %586 = vmatprep.subr.bf16.mxu0 %v768_v0 }
  0x7b   :  { %585 = vmatpush3.bf16.msra.mxu1 %v584_v50 }
  0x7c   :  { %466 = vmatmul.mubr.f32.vlgmr.msra.gmra.mrb[0].mxu0 %v85_v47 }
  0x7d   :  { %535 = vmatprep.mubr.msk.f32.mxu0 %vm769_vm0, %v770_v1  ;;  %588 = vmatpush3.bf16.msra.mxu0 %v587_v54  ;;  %v279_v1 = vld [vmem:[#allocation8 + $0x48] sm:$0xff] }
  0x7e   :  { %589 = vmatprep.subr.bf16.mxu0 %v768_v0  ;;  %v599_v2 = vpack.c.bf16 %v279_v1, %v278_v63 }
  0x81   :  { %591 = vmatpush3.bf16.msra.mxu0 %v590_v56 }
  0x82   :  { %592 = vmatprep.subr.bf16.mxu0 %v768_v0 }
  0x85   :  { %594 = vmatpush3.bf16.msra.mxu0 %v593_v59 }
  0x86   :  { %595 = vmatprep.subr.bf16.mxu0 %v768_v0 }
  0x89   :  { %597 = vmatpush3.bf16.msra.mxu0 %v596_v62 }
  0x8a   :  { %598 = vmatprep.subr.bf16.mxu0 %v768_v0 }
  0x8d   :  { %600 = vmatpush3.bf16.msra.mxu0 %v599_v2 }
  0x8e   :  { %601 = vmatprep.subr.bf16.mxu0 %v768_v0 }
  0x91   :  { %603 = vmatpush3.bf16.msra.mxu0 %v602_v5 }
  0x92   :  { %604 = vmatprep.subr.bf16.mxu0 %v768_v0 }
  0x95   :  { %606 = vmatpush3.bf16.msra.mxu0 %v605_v8 }
  0x96   :  { %607 = vmatprep.subr.bf16.mxu0 %v768_v0 }
  0x99   :  { %609 = vmatpush3.bf16.msra.mxu0 %v608_v16 }
 0x14f   :  { %v173_v10 = vpop.f32.mrb[0].mxu0 }
 0x150   :  { %v174_v11 = vadd.f32 %v379_v9, %v173_v10  ;;  %v467_v12 = vpop.f32.mrb[1].mxu0 }
 0x152   :  { %v177_v13 = vmax.f32 %v174_v11, 0.0 }
 0x154   :  { %501 = vmatmul.mubr.f32.vlgmr.msra.gmra.mrb[0].mxu1 %v177_v13 }
 0x227   :  { %v265_v18 = vpop.f32.mrb[0].mxu1 }
 0x228   :  { %v266_v19 = vadd.f32 %v380_v17, %v265_v18  ;;  %v502_v20 = vpop.f32.mrb[1].mxu1 }
 0x22a   :  { %v269_v21 = vmax.f32 %v266_v19, 0.0 }
 0x22c   :  { %536 = vmatmul.mubr.f32.vlgmr.msra.gmra.mrb[2].mxu0 %v269_v21 }
 0x2ff   :  { %v357_v0 = vpop.f32.mrb[2].mxu0 }
 0x300   :  { %v358_v23 = vadd.f32 %v381_v22, %v357_v0  ;;  %v537_v24 = vpop.f32.mrb[3].mxu0 }
 0x302   :  { %361 = vst [vmem:[#allocation11] sm:$0xff] %v358_v23 }
 0x303   :  { %742 = shalt.err (!%p739_p2)
}
 0x304   :  { %s743_s30 = scalar_lea.hbm %s918_s5, 128 }
 0x305   :  { %p744_p3 = scmp.ne.s32.totalorder %s918_s5, %s743_s30  ;;  %p747_p4 = scmp.lt.u32.totalorder %s743_s30, %s918_s5 }
 0x307   :  { %p749_p5 = pnand %p747_p4, %p744_p3 }
 0x309   :  { %752 = shalt.err (!%p749_p5)
}
 0x30a   :  { %371 = dma.vmem_to_hbm [thread:$0]  %s369_s29, 128, %s918_s5, [#allocation4]  }
 0x30b   :  { %759 = dma.done.wait [#allocation4], 128  }
 0x30c   :  { %760 = vsyncadd [#allocation4], 4294967168 }
 0x30d   :  { %375 = vsyncpa [#allocation3], 1 }
 0x30e   :  { %376 = vsyncpa [#allocation6], 1 }
 0x30f   :  { %377 = vsyncpa [#allocation9], 1 }
 0x310   :  { %378 = vsyncpa [#allocation4], 1 }

</bundles_post_ra>
